<compile_context>
chip_gen: v5e
topology: v5e:2x2
jax: 0.10.0
libtpu: 0.0.40
codegen_flags: <defaults>
</compile_context>

<pallas_src>
import math

import jax
import jax.numpy as jnp
from jax.experimental import pallas as pl
from jax.experimental.pallas import tpu as pltpu

_LANES = 128


def _gelu_tanh_kernel(x_ref, o_ref):
    x = x_ref[...].astype(jnp.float32)
    c = math.sqrt(2.0 / math.pi)
    inner = c * (x + 0.044715 * x * x * x)
    y = 0.5 * x * (1.0 + jnp.tanh(inner))
    o_ref[...] = y.astype(o_ref.dtype)


def gelu_tanh(x: jax.Array, *, target_block_bytes: int = 2 * 1024 * 1024) -> jax.Array:
    """Elementwise GELU (approximate='tanh'), matching F.gelu(x, approximate='tanh')."""
    orig_shape = x.shape
    orig_dtype = x.dtype
    n = x.size
    if n == 0:
        return x

    itemsize = jnp.dtype(orig_dtype).itemsize
    x_flat = jnp.ravel(x)  # free bitcast when no padding is needed

    # Minimal pad only if the flat length is not lane-aligned (GELU(0) == 0).
    rem = n % _LANES
    padded = rem != 0
    if padded:
        x_flat = jnp.pad(x_flat, (0, _LANES - rem))

    rows = x_flat.size // _LANES
    x2d = x_flat.reshape(rows, _LANES)

    # Row tile sized so each VMEM buffer is ~target_block_bytes (mem-bound:
    # big tiles amortize the ~0.35us per-grid-step overhead). Multiple of 8.
    tm = max(8, (target_block_bytes // (_LANES * itemsize)) // 8 * 8)

    # Keep at least 2 grid steps when possible so both v7x TensorCores stream.
    if rows > 8:
        half_rows = ((pl.cdiv(rows, 2) + 7) // 8) * 8
        tm = min(tm, half_rows)

    if tm >= rows:
        tm = rows  # single full-extent block (always legal)
    grid = (pl.cdiv(rows, tm),)

    out2d = pl.pallas_call(
        _gelu_tanh_kernel,
        out_shape=jax.ShapeDtypeStruct((rows, _LANES), orig_dtype),
        grid_spec=pltpu.PrefetchScalarGridSpec(
            num_scalar_prefetch=0,
            grid=grid,
            in_specs=[pl.BlockSpec((tm, _LANES), lambda i: (i, 0))],
            out_specs=pl.BlockSpec((tm, _LANES), lambda i: (i, 0)),
        ),
        compiler_params=pltpu.CompilerParams(
            dimension_semantics=("parallel",),
        ),
        cost_estimate=pl.CostEstimate(
            flops=8 * n,
            transcendentals=n,
            bytes_accessed=2 * n * itemsize,
        ),
    )(x2d)

    if padded:
        out_flat = out2d.reshape(-1)[:n]
    else:
        out_flat = out2d.reshape(-1)
    return out_flat.reshape(orig_shape)


if __name__ == "__main__":
    key = jax.random.PRNGKey(0)
    x = jax.random.normal(key, (2, 4, 16, 16), dtype=jnp.float32)  # NCHW

    y = gelu_tanh(x)
    jax.block_until_ready(y)

    # Reference check (pure JAX tanh-approx GELU).
    c = math.sqrt(2.0 / math.pi)
    y_ref = 0.5 * x * (1.0 + jnp.tanh(c * (x + 0.044715 * x ** 3)))
    assert y.shape == x.shape and y.dtype == x.dtype
    assert jnp.max(jnp.abs(y - y_ref)) < 1e-5

    # Also exercise a non-lane-aligned shape (partial-block / pad path).
    x2 = jax.random.normal(jax.random.PRNGKey(1), (3, 5, 7), dtype=jnp.float32)
    y2 = gelu_tanh(x2)
    y2_ref = 0.5 * x2 * (1.0 + jnp.tanh(c * (x2 + 0.044715 * x2 ** 3)))
    assert jnp.max(jnp.abs(y2 - y2_ref)) < 1e-5

    print("KERNEL_OK")
</pallas_src>

<mosaic_0001>
module attributes {stable_mosaic.version = 11 : i64} {
  func.func @_gelu_tanh_kernel(%arg0: i32, %arg1: memref<8x128xf32, #tpu.memory_space<vmem>>, %arg2: memref<8x128xf32, #tpu.memory_space<vmem>>) attributes {dimension_semantics = [#tpu.dimension_semantics<parallel>], iteration_bounds = array<i64: 2>, scalar_prefetch = 0 : i64, scratch_operands = 0 : i64, tpu.core_type = #tpu.core_type<tc>, window_params = [{transform_indices = @transform_0, window_bounds = array<i64: 8, 128>}, {transform_indices = @transform_1, window_bounds = array<i64: 8, 128>}]} {
    %c0 = arith.constant 0 : index
    %c0_0 = arith.constant 0 : index
    %0 = vector.load %arg1[%c0, %c0_0] : memref<8x128xf32, #tpu.memory_space<vmem>>, vector<8x128xf32>
    %cst = arith.constant 4.471500e-02 : f32
    %1 = vector.broadcast %cst : f32 to vector<8x128xf32>
    %2 = arith.mulf %1, %0 : vector<8x128xf32>
    %3 = arith.mulf %2, %0 : vector<8x128xf32>
    %4 = arith.mulf %3, %0 : vector<8x128xf32>
    %5 = arith.addf %0, %4 : vector<8x128xf32>
    %cst_1 = arith.constant 0.797884583 : f32
    %6 = vector.broadcast %cst_1 : f32 to vector<8x128xf32>
    %7 = arith.mulf %6, %5 : vector<8x128xf32>
    %cst_2 = arith.constant 5.000000e-01 : f32
    %8 = vector.broadcast %cst_2 : f32 to vector<8x128xf32>
    %9 = arith.mulf %8, %0 : vector<8x128xf32>
    %10 = math.tanh %7 : vector<8x128xf32>
    %cst_3 = arith.constant 1.000000e+00 : f32
    %11 = vector.broadcast %cst_3 : f32 to vector<8x128xf32>
    %12 = arith.addf %11, %10 : vector<8x128xf32>
    %13 = arith.mulf %9, %12 : vector<8x128xf32>
    %c0_4 = arith.constant 0 : index
    %c0_5 = arith.constant 0 : index
    %14 = vector.load %arg2[%c0_4, %c0_5] : memref<8x128xf32, #tpu.memory_space<vmem>>, vector<8x128xf32>
    tpu.vector_store %arg2[%c0_4, %c0_5], %13 {strides = array<i32>} : memref<8x128xf32, #tpu.memory_space<vmem>>, vector<8x128xf32>,
    return
  }
  func.func @transform_0(%arg0: i32) -> (i32, i32) {
    %c0_i32 = arith.constant 0 : i32
    %c0_i32_0 = arith.constant 0 : i32
    return %arg0, %c0_i32 : i32, i32
  }
  func.func @transform_1(%arg0: i32) -> (i32, i32) {
    %c0_i32 = arith.constant 0 : i32
    %c0_i32_0 = arith.constant 0 : i32
    return %arg0, %c0_i32 : i32, i32
  }
}

</mosaic_0001>

<bundles_post_ra>
// kernel: tpu_custom_call.1
= control target key start
LH: loop header
LB: loop body
LE: loop exit
PB: predicated region body
PF: predicated region fallthrough
CT: control target
= control target key end

     0   :  { %6 = vsyncpa [#allocation3], 0  ;;  %s526_s0 = inlined_call_operand.hbm [shape: f32[16,128], index: 0, kind: input, shape index: {}]   ;;  %s527_s1 = inlined_call_operand.hbm [shape: f32[16,128], index: 1, kind: output, shape index: {}]  }
   0x1   :  { %8 = vsyncpa [#allocation3 + $0x1], 0 }
   0x2   :  { %9 = vsyncpa [#allocation4], 0 }
   0x3   :  { %11 = vsyncpa [#allocation4 + $0x1], 0  ;;  %s399_s6 = smov 0   ;;  %s401_s7 = smov 0  }
   0x4   :  { %s403_s8 = smov 0   ;;  %s405_s9 = smov 0  }
   0x5 LB: > { %s420_s10 = sadd.s32 4294967295, %s387_s9   ;;  %s231_s11 = sadd.s32 4294967294, %s387_s9   ;;  %s387_s9 = sphi %s405_s9, %s537_s9   ;;  %s383_s8 = sphi %s403_s8, %s536_s8   ;;  %s379_s7 = sphi %s401_s7, %s535_s7   ;;  %s375_s6 = sphi %s399_s6, %s534_s6  }
   0x6   : > { %s424_s12 = sadd.s32 1, %s387_s9   ;;  %s24_s13 = sadd.s32 1, %s383_s8 }
   0x7   : > { %s21_s14 = ssub.s32 %s387_s9, %s424_s12  ;;  %p31_p0 = scmp.ne.s32.totalorder %s383_s8, %s379_s7 }
   0x8   : > { %p22_p1 = scmp.eq.s32.totalorder %s21_s14, 0  ;;  %p32_p2 = scmp.eq.s32.totalorder %s387_s9, 0 }
   0x9   : > { %p37_p3 = scmp.ne.s32.totalorder %s379_s7, %s375_s6  ;;  %p38_p4 = scmp.eq.s32.totalorder %s420_s10, 0 }
   0xa   : > { %s436_s15 = scalar_select %p22_p1, %s383_s8, %s24_s13  }
   0xb   : > { %p438_p5 = por %p32_p2, %p31_p0  ;;  %p442_p6 = por %p38_p4, %p37_p3 }
   0xc   : > { %p61_p7 = scmp.eq.s32.totalorder %s420_s10, 1  ;;  %p67_p8 = scmp.eq.s32.totalorder %s231_s11, 1 }
   0xd   : > { %p255_p10 = scmp.lt.s32.totalorder %s387_s9, 2  ;;  %s87_s20 = sand.u32 1, %s383_s8  }
   0xe   : > { %p449_p11 = por %p61_p7, %p31_p0  ;;  %p453_p12 = por %p67_p8, %p37_p3 }
   0xf   : > { %s235_s21 = sshll.u32 %s387_s9, 3  ;;  %s234_s22 = sshll.u32 %s87_s20, 3 }
  0x10   : > { %s95_s25 = scalar_lea.hbm %s526_s0, %s235_s21  ;;  %s91_s27 = scalar_lea.vmem [#allocation2], %s234_s22 }
  0x11   : > { %s97_s26 = sshll.u32 %s95_s25, 4  ;;  %s99_s28 = sshll.u32 %s91_s27, 4  ;;  %s98_s26 = int_to_ptr.hbm [resolvable:$true] %s97_s26  ;;  %s100_s28 = int_to_ptr.vmem [resolvable:$true] %s99_s28 }
  0x12   : > { %p464_p13 = pnand %p255_p10, %p438_p5  ;;  %p236_p0 = scmp.ge.s32.totalorder %s387_s9, 1 }
  0x13   : > { %p104_p1 = scmp.lt.s32.totalorder %s387_s9, 3  ;;  %s88_s30 = scalar_lea.sflag [#allocation3], %s87_s20 }
  0x14   : > { %s291_s2 = sshra.s32 %s98_s26, 4  ;;  %p295_p3 = pneg %p464_p13  ;;  %s292_s2 = int_to_ptr.hbm [resolvable:$true] %s291_s2 }
  0x15   : > { %s293_s3 = scalar_lea.hbm %s292_s2, 8  ;;  %s298_s11 = scalar_lea.hbm %s526_s0, 16 }
  0x16   : > { %p294_p2 = scmp.ne.s32.totalorder %s292_s2, %s293_s3  ;;  %p299_p5 = scmp.lt.s32.totalorder %s292_s2, %s526_s0 }
  0x17   : > { %p300_p8 = scmp.lt.s32.totalorder %s298_s11, %s293_s3 }
  0x18   : > { %p296_p4 = pnand %p295_p3, %p294_p2 }
  0x19   : > { %p301_p10 = por %p300_p8, %p299_p5 }
  0x1a   : > { %p297_p7 = pneg %p296_p4 }
  0x1c   : > { %p302_p9 = pnand %p301_p10, %p297_p7 }
  0x1e   : > { %305 = shalt.err (!%p302_p9)
}
  0x1f   : > { %250 = dma.hbm_to_vmem [thread:$0]  (!%p464_p13), %s98_s26, 128, %s100_s28, %s88_s30  }
  0x20   : > { %p105_p2 = pnand %p236_p0, %p104_p1 }
  0x21   : > { %s485_s16 = sand.u32 (!%p105_p2), 1, %s379_s7  }
  0x22   : > { %108 = sbr.rel (%p105_p2) target bundleno = 65 (0x41), region = 24  ;;  %s237_s20 = sshll.u32 (!%p105_p2), %s485_s16, 3 }
  0x23   : > { %s111_s21 = scalar_lea.sflag (!%p105_p2), [#allocation3], %s485_s16  ;;  %s114_s22 = scalar_lea.vmem (!%p105_p2), [#allocation2], %s237_s20 }
  0x27   : > { %366 = dma.done.wait (%p442_p6), %s111_s21, 128  }
  0x28   : > { %368 = vsyncadd (%p442_p6), %s111_s21, 4294967168  ;;  %v134_v0 = vld [vmem:[%s114_s22] sm:$0xff]  ;;  %s240_s23 = sshll.u32 %s420_s10, 3  ;;  %s133_s27 = scalar_lea.vmem [#allocation5], %s237_s20 }
  0x29   : > { %v135_v1 = vmul.f32 0.044715, %v134_v0  ;;  %s156_s26 = scalar_lea.hbm %s527_s1, %s240_s23  ;;  %v140_v6 = vmul.f32 0.5, %v134_v0  ;;  %s158_s17 = sshll.u32 %s133_s27, 4  ;;  %s159_s17 = int_to_ptr.vmem [resolvable:$true] %s158_s17 }
  0x2a   : > { %s160_s28 = sshll.u32 %s156_s26, 4  ;;  %s146_s29 = scalar_lea.sflag [#allocation4], %s485_s16  ;;  %s161_s28 = int_to_ptr.hbm [resolvable:$true] %s160_s28 }
  0x2b   : > { %v136_v2 = vmul.f32 %v135_v1, %v134_v0  ;;  %s335_s30 = sshra.s32 %s161_s28, 4  ;;  %s341_s4 = scalar_lea.hbm %s527_s1, 16  ;;  %s336_s30 = int_to_ptr.hbm [resolvable:$true] %s335_s30 }
  0x2c   : > { %s337_s2 = scalar_lea.hbm %s336_s30, 8  ;;  %p342_p0 = scmp.lt.s32.totalorder %s336_s30, %s527_s1 }
  0x2d   : > { %v137_v3 = vmul.f32 %v136_v2, %v134_v0  ;;  %p338_p6 = scmp.ne.s32.totalorder %s336_s30, %s337_s2  ;;  %p343_p1 = scmp.lt.s32.totalorder %s341_s4, %s337_s2 }
  0x2f   : > { %v138_v4 = vadd.f32 %v137_v3, %v134_v0  ;;  %p339_p9 = pnand %p338_p6, %p449_p11  ;;  %p344_p3 = por %p343_p1, %p342_p0 }
  0x31   : > { %v139_v5 = vmul.f32 0.7978846, %v138_v4  ;;  %p340_p13 = pneg %p339_p9 }
  0x33   : > { %289 = vtanh.f32 %v139_v5  ;;  %p345_p4 = pnand %p344_p3, %p340_p13 }
  0x39   : > { %v290_v7 = vpop.eup %289 }
  0x3a   : > { %v142_v8 = vadd.f32 1.0, %v290_v7 }
  0x3c   : > { %v143_v9 = vmul.f32 %v142_v8, %v140_v6 }
  0x3e   : > { %144 = vst [vmem:[%s133_s27] sm:$0xff] %v143_v9 }
  0x3f   : > { %348 = shalt.err (!%p345_p4)
}
  0x40   : > { %245 = dma.vmem_to_hbm [thread:$0]  (%p449_p11), %s159_s17, 128, %s161_s28, %s146_s29  }
  0x41 PF: > { %s172_s13 = sand.u32 1, %s375_s6   ;;  %p533_p7 = scmp.ge.s32.totalorder %s387_s9, 2 }
  0x42   : > { %s173_s14 = scalar_lea.sflag [#allocation4], %s172_s13 }
  0x43   : > { %p252_p5 = pnand %p533_p7, %p453_p12 }
  0x45   : > { %p253_p8 = pneg %p252_p5 }
  0x47   : > { %370 = dma.done.wait (%p253_p8), %s173_s14, 128  }
  0x48   : > { %372 = vsyncadd (%p253_p8), %s173_s14, 4294967168  ;;  %p14_p10 = scmp.ge.s32.totalorder %s424_s12, 4   ;;  %s534_s6 = smov %s379_s7 }
  0x49   : > { %s535_s7 = smov %s383_s8  ;;  %s536_s8 = smov %s436_s15 }
  0x4a   : > { %s537_s9 = smov %s424_s12  ;;  %16 = sbr.rel (!%p14_p10) target bundleno = 5 (0x5), region = 69 }
  0x4f   :  { %179 = vsyncpa [#allocation3], 1 }
  0x50   :  { %181 = vsyncpa [#allocation3 + $0x1], 1 }
  0x51   :  { %182 = vsyncpa [#allocation4], 1 }
  0x52   :  { %184 = vsyncpa [#allocation4 + $0x1], 1 }

</bundles_post_ra>
